<compile_context>
chip_gen: v7x
topology: tpu7x:2x2x1
jax: 0.10.0
libtpu: 0.0.40
codegen_flags: <defaults>
</compile_context>

<pallas_src>
import math

import jax
import jax.numpy as jnp
from jax import lax
from jax.experimental import pallas as pl
from jax.experimental.pallas import tpu as pltpu


def lstm_fused_kernel(xw_ref, wih_ref, whh_ref, h_out_ref):
    """Fused input projection + serial LSTM recurrence.

    xw_ref   : (T*Bp, K)  f32  flattened inputs, col I holds 1.0 (bias column)
    wih_ref  : (K, 4H)    f32  [W_ih^T ; b_ih+b_hh ; 0-pad], g-lanes pre-scaled x2
    whh_ref  : (H, 4H)    f32  W_hh^T, g-lanes pre-scaled x2
    h_out_ref: (Bp, H)    f32  final hidden state (rows >= B are padding)
    Gate order along the 4H (lane) axis is PyTorch's [i, f, g, o].
    """
    Bp, H = h_out_ref.shape
    T = xw_ref.shape[0] // Bp

    # --- one-time preamble: all timesteps' gate pre-activations (incl. bias)
    xg = jnp.dot(xw_ref[...], wih_ref[...],
                 preferred_element_type=jnp.float32)          # (T*Bp, 4H)

    whh = whh_ref[...]            # (H, 4H); loaded once, lives in vregs

    h = None
    c = None
    # Fully unrolled: T is small and static, so the scheduler sees the whole
    # chain and h/c never round-trip through VMEM.
    for t in range(T):
        gates = xg[t * Bp:(t + 1) * Bp, :]                    # (Bp, 4H)
        if t > 0:
            gates = gates + jnp.dot(h, whh,
                                    preferred_element_type=jnp.float32)

        # Single EUP sigmoid pass over the lane-dense (Bp, 4H) vreg.  The
        # g-gate lanes were pre-scaled by 2, so tanh(g) = 2*sigmoid(2g) - 1
        # is recovered with cheap VPU ops (no second full-width tanh).
        sig = jax.nn.sigmoid(gates)
        i_g = sig[:, 0:H]
        f_g = sig[:, H:2 * H]
        g_g = 2.0 * sig[:, 2 * H:3 * H] - 1.0
        o_g = sig[:, 3 * H:4 * H]

        if t == 0:
            c = i_g * g_g                                     # c0 == 0
        else:
            c = f_g * c + i_g * g_g
        h = o_g * jnp.tanh(c)                                 # narrow EUP pass

    h_out_ref[...] = h.astype(h_out_ref.dtype)


def rnn_branch_forward(x, w_ih, w_hh, b_ih, b_hh):
    """Equivalent of RNNBranch.forward.

    x     : (B, 3, T)  -- layout PyTorch receives (before its permute)
    w_ih  : (4H, 3), w_hh: (4H, H), b_ih/b_hh: (4H,)  -- PyTorch param shapes
    returns h_n of shape (B, H)
    """
    B, I, T = x.shape
    H = w_hh.shape[1]
    f32 = jnp.float32

    Bp = ((B + 7) // 8) * 8            # pad batch to full 8-sublane tiles
    K = 8                              # padded contraction dim (I real + 1 bias + zeros)

    # g-lane pre-scale (x2) so the kernel can use tanh(g) = 2*sigmoid(2g) - 1.
    gscale = jnp.ones((4 * H,), f32).at[2 * H:3 * H].set(2.0)

    # Augmented input-projection weights: rows 0..I-1 = W_ih^T, row I = fused
    # bias, remaining rows zero.  Scaled on the g lanes.
    w_aug = jnp.zeros((K, 4 * H), f32)
    w_aug = w_aug.at[:I, :].set(jnp.transpose(w_ih).astype(f32))
    w_aug = w_aug.at[I, :].set((b_ih + b_hh).astype(f32))
    w_aug = w_aug * gscale[None, :]

    whh_t = jnp.transpose(w_hh).astype(f32) * gscale[None, :]   # (H, 4H)

    # x -> (T, Bp, I) -> flattened (T*Bp, K) with a ones column for the bias.
    x_tbi = jnp.transpose(x, (2, 0, 1)).astype(f32)              # (T, B, I)
    x_tbi = jnp.pad(x_tbi, ((0, 0), (0, Bp - B), (0, 0)))        # (T, Bp, I)
    x_aug = jnp.zeros((T * Bp, K), f32)
    x_aug = x_aug.at[:, :I].set(x_tbi.reshape(T * Bp, I))
    x_aug = x_aug.at[:, I].set(1.0)

    cost = pl.CostEstimate(
        flops=int(2 * T * Bp * K * 4 * H            # fused input projection
                  + 2 * (T - 1) * Bp * H * 4 * H    # recurrent matmuls
                  + 10 * T * Bp * 4 * H),           # elementwise LSTM update
        transcendentals=int(T * Bp * 4 * H + T * Bp * H),
        bytes_accessed=int(4 * (x_aug.size + w_aug.size + whh_t.size + Bp * H)),
    )

    h_pad = pl.pallas_call(
        lstm_fused_kernel,
        out_shape=jax.ShapeDtypeStruct((Bp, H), f32),
        in_specs=[
            pl.BlockSpec(memory_space=pltpu.MemorySpace.VMEM),  # x_aug
            pl.BlockSpec(memory_space=pltpu.MemorySpace.VMEM),  # w_aug
            pl.BlockSpec(memory_space=pltpu.MemorySpace.VMEM),  # whh_t
        ],
        out_specs=pl.BlockSpec(memory_space=pltpu.MemorySpace.VMEM),
        cost_estimate=cost,
    )(x_aug, w_aug, whh_t)

    return h_pad[:B].astype(x.dtype)


def rnn_branch_reference(x, w_ih, w_hh, b_ih, b_hh):
    """Pure-JAX reference (mirrors torch.nn.LSTM semantics, gate order i,f,g,o)."""
    B, I, T = x.shape
    H = w_hh.shape[1]
    xs = jnp.transpose(x, (2, 0, 1)).astype(jnp.float32)         # (T, B, I)
    b = (b_ih + b_hh).astype(jnp.float32)
    wih_t = jnp.transpose(w_ih).astype(jnp.float32)
    whh_t = jnp.transpose(w_hh).astype(jnp.float32)

    def step(carry, x_t):
        h, c = carry
        gates = x_t @ wih_t + h @ whh_t + b
        i_g = jax.nn.sigmoid(gates[:, 0:H])
        f_g = jax.nn.sigmoid(gates[:, H:2 * H])
        g_g = jnp.tanh(gates[:, 2 * H:3 * H])
        o_g = jax.nn.sigmoid(gates[:, 3 * H:4 * H])
        c_new = f_g * c + i_g * g_g
        h_new = o_g * jnp.tanh(c_new)
        return (h_new, c_new), None

    h0 = jnp.zeros((B, H), jnp.float32)
    c0 = jnp.zeros((B, H), jnp.float32)
    (h_n, _), _ = lax.scan(step, (h0, c0), xs)
    return h_n.astype(x.dtype)


if __name__ == "__main__":
    B, I, T, H = 2, 3, 8, 32

    key = jax.random.PRNGKey(0)
    k_x, k_wih, k_whh, k_bih, k_bhh = jax.random.split(key, 5)

    # Deterministic parameter init, same shapes/ranges as nn.LSTM defaults.
    bound = 1.0 / math.sqrt(H)
    x = jax.random.normal(k_x, (B, I, T), dtype=jnp.float32)
    w_ih = jax.random.uniform(k_wih, (4 * H, I), minval=-bound, maxval=bound,
                              dtype=jnp.float32)
    w_hh = jax.random.uniform(k_whh, (4 * H, H), minval=-bound, maxval=bound,
                              dtype=jnp.float32)
    b_ih = jax.random.uniform(k_bih, (4 * H,), minval=-bound, maxval=bound,
                              dtype=jnp.float32)
    b_hh = jax.random.uniform(k_bhh, (4 * H,), minval=-bound, maxval=bound,
                              dtype=jnp.float32)

    h_n = rnn_branch_forward(x, w_ih, w_hh, b_ih, b_hh)
    h_n = jax.block_until_ready(h_n)

    h_ref = rnn_branch_reference(x, w_ih, w_hh, b_ih, b_hh)
    assert h_n.shape == (B, H)
    assert jnp.allclose(h_n, h_ref, atol=1e-5, rtol=1e-5)

    print("KERNEL_OK")
</pallas_src>

<mosaic_0001>
module attributes {stable_mosaic.version = 11 : i64} {
  func.func @lstm_fused_kernel(%arg0: memref<64x8xf32, #tpu.memory_space<vmem>>, %arg1: memref<8x128xf32, #tpu.memory_space<vmem>>, %arg2: memref<32x128xf32, #tpu.memory_space<vmem>>, %arg3: memref<8x32xf32, #tpu.memory_space<vmem>>) attributes {dimension_semantics = [], scalar_prefetch = 0 : i64, scratch_operands = 0 : i64, tpu.core_type = #tpu.core_type<tc>} {
    %c0 = arith.constant 0 : index
    %c0_0 = arith.constant 0 : index
    %0 = vector.load %arg0[%c0, %c0_0] : memref<64x8xf32, #tpu.memory_space<vmem>>, vector<64x8xf32>
    %c0_1 = arith.constant 0 : index
    %c0_2 = arith.constant 0 : index
    %1 = vector.load %arg1[%c0_1, %c0_2] : memref<8x128xf32, #tpu.memory_space<vmem>>, vector<8x128xf32>
    %cst = arith.constant dense<0.000000e+00> : vector<64x128xf32>
    %2 = tpu.matmul %0, %1, %cst {dimension_numbers = #tpu.dot_dimension_numbers<[1], [0], [0], [1], [0, 0, 1, 1], [], []>} : vector<64x8xf32>, vector<8x128xf32>, vector<64x128xf32> -> vector<64x128xf32>
    %c0_3 = arith.constant 0 : index
    %c0_4 = arith.constant 0 : index
    %3 = vector.load %arg2[%c0_3, %c0_4] : memref<32x128xf32, #tpu.memory_space<vmem>>, vector<32x128xf32>
    %4 = vector.extract_strided_slice %2 {offsets = [0, 0], sizes = [8, 128], strides = [1, 1]} : vector<64x128xf32> to vector<8x128xf32>
    %5 = arith.negf %4 : vector<8x128xf32>
    %6 = math.exp %5 : vector<8x128xf32>
    %cst_5 = arith.constant 1.000000e+00 : f32
    %7 = vector.broadcast %cst_5 : f32 to vector<8x128xf32>
    %8 = arith.addf %7, %6 : vector<8x128xf32>
    %9 = arith.divf %7, %8 : vector<8x128xf32>
    %10 = vector.extract_strided_slice %9 {offsets = [0, 0], sizes = [8, 32], strides = [1, 1]} : vector<8x128xf32> to vector<8x32xf32>
    %11 = vector.extract_strided_slice %9 {offsets = [0, 64], sizes = [8, 32], strides = [1, 1]} : vector<8x128xf32> to vector<8x32xf32>
    %cst_6 = arith.constant 2.000000e+00 : f32
    %12 = vector.broadcast %cst_6 : f32 to vector<8x32xf32>
    %13 = arith.mulf %12, %11 : vector<8x32xf32>
    %cst_7 = arith.constant 1.000000e+00 : f32
    %14 = vector.broadcast %cst_7 : f32 to vector<8x32xf32>
    %15 = arith.subf %13, %14 : vector<8x32xf32>
    %16 = vector.extract_strided_slice %9 {offsets = [0, 96], sizes = [8, 32], strides = [1, 1]} : vector<8x128xf32> to vector<8x32xf32>
    %17 = arith.mulf %10, %15 : vector<8x32xf32>
    %18 = math.tanh %17 : vector<8x32xf32>
    %19 = arith.mulf %16, %18 : vector<8x32xf32>
    %20 = vector.extract_strided_slice %2 {offsets = [8, 0], sizes = [8, 128], strides = [1, 1]} : vector<64x128xf32> to vector<8x128xf32>
    %cst_8 = arith.constant dense<0.000000e+00> : vector<8x128xf32>
    %21 = tpu.matmul %19, %3, %cst_8 {dimension_numbers = #tpu.dot_dimension_numbers<[1], [0], [0], [1], [0, 0, 1, 1], [], []>} : vector<8x32xf32>, vector<32x128xf32>, vector<8x128xf32> -> vector<8x128xf32>
    %22 = arith.addf %20, %21 : vector<8x128xf32>
    %23 = arith.negf %22 : vector<8x128xf32>
    %24 = math.exp %23 : vector<8x128xf32>
    %cst_9 = arith.constant 1.000000e+00 : f32
    %25 = vector.broadcast %cst_9 : f32 to vector<8x128xf32>
    %26 = arith.addf %25, %24 : vector<8x128xf32>
    %27 = arith.divf %25, %26 : vector<8x128xf32>
    %28 = vector.extract_strided_slice %27 {offsets = [0, 0], sizes = [8, 32], strides = [1, 1]} : vector<8x128xf32> to vector<8x32xf32>
    %29 = vector.extract_strided_slice %27 {offsets = [0, 32], sizes = [8, 32], strides = [1, 1]} : vector<8x128xf32> to vector<8x32xf32>
    %30 = vector.extract_strided_slice %27 {offsets = [0, 64], sizes = [8, 32], strides = [1, 1]} : vector<8x128xf32> to vector<8x32xf32>
    %cst_10 = arith.constant 2.000000e+00 : f32
    %31 = vector.broadcast %cst_10 : f32 to vector<8x32xf32>
    %32 = arith.mulf %31, %30 : vector<8x32xf32>
    %cst_11 = arith.constant 1.000000e+00 : f32
    %33 = vector.broadcast %cst_11 : f32 to vector<8x32xf32>
    %34 = arith.subf %32, %33 : vector<8x32xf32>
    %35 = vector.extract_strided_slice %27 {offsets = [0, 96], sizes = [8, 32], strides = [1, 1]} : vector<8x128xf32> to vector<8x32xf32>
    %36 = arith.mulf %29, %17 : vector<8x32xf32>
    %37 = arith.mulf %28, %34 : vector<8x32xf32>
    %38 = arith.addf %36, %37 : vector<8x32xf32>
    %39 = math.tanh %38 : vector<8x32xf32>
    %40 = arith.mulf %35, %39 : vector<8x32xf32>
    %41 = vector.extract_strided_slice %2 {offsets = [16, 0], sizes = [8, 128], strides = [1, 1]} : vector<64x128xf32> to vector<8x128xf32>
    %cst_12 = arith.constant dense<0.000000e+00> : vector<8x128xf32>
    %42 = tpu.matmul %40, %3, %cst_12 {dimension_numbers = #tpu.dot_dimension_numbers<[1], [0], [0], [1], [0, 0, 1, 1], [], []>} : vector<8x32xf32>, vector<32x128xf32>, vector<8x128xf32> -> vector<8x128xf32>
    %43 = arith.addf %41, %42 : vector<8x128xf32>
    %44 = arith.negf %43 : vector<8x128xf32>
    %45 = math.exp %44 : vector<8x128xf32>
    %cst_13 = arith.constant 1.000000e+00 : f32
    %46 = vector.broadcast %cst_13 : f32 to vector<8x128xf32>
    %47 = arith.addf %46, %45 : vector<8x128xf32>
    %48 = arith.divf %46, %47 : vector<8x128xf32>
    %49 = vector.extract_strided_slice %48 {offsets = [0, 0], sizes = [8, 32], strides = [1, 1]} : vector<8x128xf32> to vector<8x32xf32>
    %50 = vector.extract_strided_slice %48 {offsets = [0, 32], sizes = [8, 32], strides = [1, 1]} : vector<8x128xf32> to vector<8x32xf32>
    %51 = vector.extract_strided_slice %48 {offsets = [0, 64], sizes = [8, 32], strides = [1, 1]} : vector<8x128xf32> to vector<8x32xf32>
    %cst_14 = arith.constant 2.000000e+00 : f32
    %52 = vector.broadcast %cst_14 : f32 to vector<8x32xf32>
    %53 = arith.mulf %52, %51 : vector<8x32xf32>
    %cst_15 = arith.constant 1.000000e+00 : f32
    %54 = vector.broadcast %cst_15 : f32 to vector<8x32xf32>
    %55 = arith.subf %53, %54 : vector<8x32xf32>
    %56 = vector.extract_strided_slice %48 {offsets = [0, 96], sizes = [8, 32], strides = [1, 1]} : vector<8x128xf32> to vector<8x32xf32>
    %57 = arith.mulf %50, %38 : vector<8x32xf32>
    %58 = arith.mulf %49, %55 : vector<8x32xf32>
    %59 = arith.addf %57, %58 : vector<8x32xf32>
    %60 = math.tanh %59 : vector<8x32xf32>
    %61 = arith.mulf %56, %60 : vector<8x32xf32>
    %62 = vector.extract_strided_slice %2 {offsets = [24, 0], sizes = [8, 128], strides = [1, 1]} : vector<64x128xf32> to vector<8x128xf32>
    %cst_16 = arith.constant dense<0.000000e+00> : vector<8x128xf32>
    %63 = tpu.matmul %61, %3, %cst_16 {dimension_numbers = #tpu.dot_dimension_numbers<[1], [0], [0], [1], [0, 0, 1, 1], [], []>} : vector<8x32xf32>, vector<32x128xf32>, vector<8x128xf32> -> vector<8x128xf32>
    %64 = arith.addf %62, %63 : vector<8x128xf32>
    %65 = arith.negf %64 : vector<8x128xf32>
    %66 = math.exp %65 : vector<8x128xf32>
    %cst_17 = arith.constant 1.000000e+00 : f32
    %67 = vector.broadcast %cst_17 : f32 to vector<8x128xf32>
    %68 = arith.addf %67, %66 : vector<8x128xf32>
    %69 = arith.divf %67, %68 : vector<8x128xf32>
    %70 = vector.extract_strided_slice %69 {offsets = [0, 0], sizes = [8, 32], strides = [1, 1]} : vector<8x128xf32> to vector<8x32xf32>
    %71 = vector.extract_strided_slice %69 {offsets = [0, 32], sizes = [8, 32], strides = [1, 1]} : vector<8x128xf32> to vector<8x32xf32>
    %72 = vector.extract_strided_slice %69 {offsets = [0, 64], sizes = [8, 32], strides = [1, 1]} : vector<8x128xf32> to vector<8x32xf32>
    %cst_18 = arith.constant 2.000000e+00 : f32
    %73 = vector.broadcast %cst_18 : f32 to vector<8x32xf32>
    %74 = arith.mulf %73, %72 : vector<8x32xf32>
    %cst_19 = arith.constant 1.000000e+00 : f32
    %75 = vector.broadcast %cst_19 : f32 to vector<8x32xf32>
    %76 = arith.subf %74, %75 : vector<8x32xf32>
    %77 = vector.extract_strided_slice %69 {offsets = [0, 96], sizes = [8, 32], strides = [1, 1]} : vector<8x128xf32> to vector<8x32xf32>
    %78 = arith.mulf %71, %59 : vector<8x32xf32>
    %79 = arith.mulf %70, %76 : vector<8x32xf32>
    %80 = arith.addf %78, %79 : vector<8x32xf32>
    %81 = math.tanh %80 : vector<8x32xf32>
    %82 = arith.mulf %77, %81 : vector<8x32xf32>
    %83 = vector.extract_strided_slice %2 {offsets = [32, 0], sizes = [8, 128], strides = [1, 1]} : vector<64x128xf32> to vector<8x128xf32>
    %cst_20 = arith.constant dense<0.000000e+00> : vector<8x128xf32>
    %84 = tpu.matmul %82, %3, %cst_20 {dimension_numbers = #tpu.dot_dimension_numbers<[1], [0], [0], [1], [0, 0, 1, 1], [], []>} : vector<8x32xf32>, vector<32x128xf32>, vector<8x128xf32> -> vector<8x128xf32>
    %85 = arith.addf %83, %84 : vector<8x128xf32>
    %86 = arith.negf %85 : vector<8x128xf32>
    %87 = math.exp %86 : vector<8x128xf32>
    %cst_21 = arith.constant 1.000000e+00 : f32
    %88 = vector.broadcast %cst_21 : f32 to vector<8x128xf32>
    %89 = arith.addf %88, %87 : vector<8x128xf32>
    %90 = arith.divf %88, %89 : vector<8x128xf32>
    %91 = vector.extract_strided_slice %90 {offsets = [0, 0], sizes = [8, 32], strides = [1, 1]} : vector<8x128xf32> to vector<8x32xf32>
    %92 = vector.extract_strided_slice %90 {offsets = [0, 32], sizes = [8, 32], strides = [1, 1]} : vector<8x128xf32> to vector<8x32xf32>
    %93 = vector.extract_strided_slice %90 {offsets = [0, 64], sizes = [8, 32], strides = [1, 1]} : vector<8x128xf32> to vector<8x32xf32>
    %cst_22 = arith.constant 2.000000e+00 : f32
    %94 = vector.broadcast %cst_22 : f32 to vector<8x32xf32>
    %95 = arith.mulf %94, %93 : vector<8x32xf32>
    %cst_23 = arith.constant 1.000000e+00 : f32
    %96 = vector.broadcast %cst_23 : f32 to vector<8x32xf32>
    %97 = arith.subf %95, %96 : vector<8x32xf32>
    %98 = vector.extract_strided_slice %90 {offsets = [0, 96], sizes = [8, 32], strides = [1, 1]} : vector<8x128xf32> to vector<8x32xf32>
    %99 = arith.mulf %92, %80 : vector<8x32xf32>
    %100 = arith.mulf %91, %97 : vector<8x32xf32>
    %101 = arith.addf %99, %100 : vector<8x32xf32>
    %102 = math.tanh %101 : vector<8x32xf32>
    %103 = arith.mulf %98, %102 : vector<8x32xf32>
    %104 = vector.extract_strided_slice %2 {offsets = [40, 0], sizes = [8, 128], strides = [1, 1]} : vector<64x128xf32> to vector<8x128xf32>
    %cst_24 = arith.constant dense<0.000000e+00> : vector<8x128xf32>
    %105 = tpu.matmul %103, %3, %cst_24 {dimension_numbers = #tpu.dot_dimension_numbers<[1], [0], [0], [1], [0, 0, 1, 1], [], []>} : vector<8x32xf32>, vector<32x128xf32>, vector<8x128xf32> -> vector<8x128xf32>
    %106 = arith.addf %104, %105 : vector<8x128xf32>
    %107 = arith.negf %106 : vector<8x128xf32>
    %108 = math.exp %107 : vector<8x128xf32>
    %cst_25 = arith.constant 1.000000e+00 : f32
    %109 = vector.broadcast %cst_25 : f32 to vector<8x128xf32>
    %110 = arith.addf %109, %108 : vector<8x128xf32>
    %111 = arith.divf %109, %110 : vector<8x128xf32>
    %112 = vector.extract_strided_slice %111 {offsets = [0, 0], sizes = [8, 32], strides = [1, 1]} : vector<8x128xf32> to vector<8x32xf32>
    %113 = vector.extract_strided_slice %111 {offsets = [0, 32], sizes = [8, 32], strides = [1, 1]} : vector<8x128xf32> to vector<8x32xf32>
    %114 = vector.extract_strided_slice %111 {offsets = [0, 64], sizes = [8, 32], strides = [1, 1]} : vector<8x128xf32> to vector<8x32xf32>
    %cst_26 = arith.constant 2.000000e+00 : f32
    %115 = vector.broadcast %cst_26 : f32 to vector<8x32xf32>
    %116 = arith.mulf %115, %114 : vector<8x32xf32>
    %cst_27 = arith.constant 1.000000e+00 : f32
    %117 = vector.broadcast %cst_27 : f32 to vector<8x32xf32>
    %118 = arith.subf %116, %117 : vector<8x32xf32>
    %119 = vector.extract_strided_slice %111 {offsets = [0, 96], sizes = [8, 32], strides = [1, 1]} : vector<8x128xf32> to vector<8x32xf32>
    %120 = arith.mulf %113, %101 : vector<8x32xf32>
    %121 = arith.mulf %112, %118 : vector<8x32xf32>
    %122 = arith.addf %120, %121 : vector<8x32xf32>
    %123 = math.tanh %122 : vector<8x32xf32>
    %124 = arith.mulf %119, %123 : vector<8x32xf32>
    %125 = vector.extract_strided_slice %2 {offsets = [48, 0], sizes = [8, 128], strides = [1, 1]} : vector<64x128xf32> to vector<8x128xf32>
    %cst_28 = arith.constant dense<0.000000e+00> : vector<8x128xf32>
    %126 = tpu.matmul %124, %3, %cst_28 {dimension_numbers = #tpu.dot_dimension_numbers<[1], [0], [0], [1], [0, 0, 1, 1], [], []>} : vector<8x32xf32>, vector<32x128xf32>, vector<8x128xf32> -> vector<8x128xf32>
    %127 = arith.addf %125, %126 : vector<8x128xf32>
    %128 = arith.negf %127 : vector<8x128xf32>
    %129 = math.exp %128 : vector<8x128xf32>
    %cst_29 = arith.constant 1.000000e+00 : f32
    %130 = vector.broadcast %cst_29 : f32 to vector<8x128xf32>
    %131 = arith.addf %130, %129 : vector<8x128xf32>
    %132 = arith.divf %130, %131 : vector<8x128xf32>
    %133 = vector.extract_strided_slice %132 {offsets = [0, 0], sizes = [8, 32], strides = [1, 1]} : vector<8x128xf32> to vector<8x32xf32>
    %134 = vector.extract_strided_slice %132 {offsets = [0, 32], sizes = [8, 32], strides = [1, 1]} : vector<8x128xf32> to vector<8x32xf32>
    %135 = vector.extract_strided_slice %132 {offsets = [0, 64], sizes = [8, 32], strides = [1, 1]} : vector<8x128xf32> to vector<8x32xf32>
    %cst_30 = arith.constant 2.000000e+00 : f32
    %136 = vector.broadcast %cst_30 : f32 to vector<8x32xf32>
    %137 = arith.mulf %136, %135 : vector<8x32xf32>
    %cst_31 = arith.constant 1.000000e+00 : f32
    %138 = vector.broadcast %cst_31 : f32 to vector<8x32xf32>
    %139 = arith.subf %137, %138 : vector<8x32xf32>
    %140 = vector.extract_strided_slice %132 {offsets = [0, 96], sizes = [8, 32], strides = [1, 1]} : vector<8x128xf32> to vector<8x32xf32>
    %141 = arith.mulf %134, %122 : vector<8x32xf32>
    %142 = arith.mulf %133, %139 : vector<8x32xf32>
    %143 = arith.addf %141, %142 : vector<8x32xf32>
    %144 = math.tanh %143 : vector<8x32xf32>
    %145 = arith.mulf %140, %144 : vector<8x32xf32>
    %146 = vector.extract_strided_slice %2 {offsets = [56, 0], sizes = [8, 128], strides = [1, 1]} : vector<64x128xf32> to vector<8x128xf32>
    %cst_32 = arith.constant dense<0.000000e+00> : vector<8x128xf32>
    %147 = tpu.matmul %145, %3, %cst_32 {dimension_numbers = #tpu.dot_dimension_numbers<[1], [0], [0], [1], [0, 0, 1, 1], [], []>} : vector<8x32xf32>, vector<32x128xf32>, vector<8x128xf32> -> vector<8x128xf32>
    %148 = arith.addf %146, %147 : vector<8x128xf32>
    %149 = arith.negf %148 : vector<8x128xf32>
    %150 = math.exp %149 : vector<8x128xf32>
    %cst_33 = arith.constant 1.000000e+00 : f32
    %151 = vector.broadcast %cst_33 : f32 to vector<8x128xf32>
    %152 = arith.addf %151, %150 : vector<8x128xf32>
    %153 = arith.divf %151, %152 : vector<8x128xf32>
    %154 = vector.extract_strided_slice %153 {offsets = [0, 0], sizes = [8, 32], strides = [1, 1]} : vector<8x128xf32> to vector<8x32xf32>
    %155 = vector.extract_strided_slice %153 {offsets = [0, 32], sizes = [8, 32], strides = [1, 1]} : vector<8x128xf32> to vector<8x32xf32>
    %156 = vector.extract_strided_slice %153 {offsets = [0, 64], sizes = [8, 32], strides = [1, 1]} : vector<8x128xf32> to vector<8x32xf32>
    %cst_34 = arith.constant 2.000000e+00 : f32
    %157 = vector.broadcast %cst_34 : f32 to vector<8x32xf32>
    %158 = arith.mulf %157, %156 : vector<8x32xf32>
    %cst_35 = arith.constant 1.000000e+00 : f32
    %159 = vector.broadcast %cst_35 : f32 to vector<8x32xf32>
    %160 = arith.subf %158, %159 : vector<8x32xf32>
    %161 = vector.extract_strided_slice %153 {offsets = [0, 96], sizes = [8, 32], strides = [1, 1]} : vector<8x128xf32> to vector<8x32xf32>
    %162 = arith.mulf %155, %143 : vector<8x32xf32>
    %163 = arith.mulf %154, %160 : vector<8x32xf32>
    %164 = arith.addf %162, %163 : vector<8x32xf32>
    %165 = math.tanh %164 : vector<8x32xf32>
    %166 = arith.mulf %161, %165 : vector<8x32xf32>
    %c0_36 = arith.constant 0 : index
    %c0_37 = arith.constant 0 : index
    %167 = vector.load %arg3[%c0_36, %c0_37] : memref<8x32xf32, #tpu.memory_space<vmem>>, vector<8x32xf32>
    tpu.vector_store %arg3[%c0_36, %c0_37], %166 {strides = array<i32>} : memref<8x32xf32, #tpu.memory_space<vmem>>, vector<8x32xf32>,
    return
  }
}

</mosaic_0001>

<bundles_post_ra>
// kernel: tpu_custom_call.1
= control target key start
LH: loop header
LB: loop body
LE: loop exit
PB: predicated region body
PF: predicated region fallthrough
CT: control target
= control target key end

     0   :  { %vm24_vm0 = vcmask 64512   ;;  %s1375_s0 = inlined_call_operand.vmem [shape: f32[64,8], index: 0, kind: input, shape index: {}]   ;;  %s1376_s1 = inlined_call_operand.vmem [shape: f32[8,128], index: 1, kind: input, shape index: {}]   ;;  %s1377_s2 = inlined_call_operand.vmem [shape: f32[32,128], index: 2, kind: input, shape index: {}]   ;;  %s1378_s3 = inlined_call_operand.hbm [shape: f32[8,32], index: 3, kind: output, shape index: {}]  }
   0x1   :  { %v23_v0 = vld [vmem:[%s1376_s1] sm:$0xff]  ;;  %v16_v2 = vld [vmem:[%s1375_s0 + $0x8] sm:$0xff] }
   0x2   :  { %v15_v1 = vld [vmem:[%s1375_s0] sm:$0xff]  ;;  %983 = vmatprep.subr.mxu0 %v23_v0 }
   0x3   :  { %985 = vmatprep.mubr.msk.f32.mxu0 %vm24_vm0, %v15_v1 }
   0x4   :  { %8 = vsyncpa [#allocation3], 0  ;;  %984 = vmatpush3.msra.mxu0 %v23_v0  ;;  %s1195_s1 = smov 64   ;;  %v154_v13 = vld [vmem:[%s1377_s2] sm:$0xff]  ;;  %v155_v14 = vld [vmem:[%s1377_s2 + $0x8] sm:$0xff]  ;;  %v1196_v16 = vmov 0.0|0.0  }
   0x5   :  { %986 = vmatmul.mubr.msk.f32.vlgmr.msra.gmra.mrb[0].mxu0 %vm24_vm0, %v16_v2  ;;  %v156_v15 = vld [vmem:[%s1377_s2 + $0x10] sm:$0xff]  ;;  %1074 = vmatprep.subr.bf16.mxu1 %v1196_v16  ;;  %v1244_v17 = vpack.c.bf16 %v155_v14, %v154_v13  ;;  %v157_v18 = vld [vmem:[%s1377_s2 + $0x18] sm:$0xff]  ;;  %vm1197_vm1 = vmmov 0   ;;  %v1198_v19 = vmov 0.0   ;;  %s1199_s2 = smov 96   ;;  %s1200_s26 = smov 32  }
   0x6   :  { %1005 = vmatprep.mubr.msk.f32.mxu1 %vm1197_vm1, %v1198_v19  ;;  %1086 = vmatprep.subr.bf16.mxu0 %v1196_v16  ;;  %v1253_v20 = vpack.c.bf16 %v157_v18, %v156_v15  ;;  %vm180_vm2 = vcmask 261120   ;;  %v17_v40 = vld [vmem:[%s1375_s0 + $0x10] sm:$0xff]  ;;  %v18_v41 = vld [vmem:[%s1375_s0 + $0x18] sm:$0xff]  ;;  %v19_v62 = vld [vmem:[%s1375_s0 + $0x20] sm:$0xff] }
   0x7   :  { %1076 = vmatpush3.bf16.msra.mxu1 %v1244_v17  ;;  %1088 = vmatpush3.bf16.msra.mxu0 %v1244_v17  ;;  %v20_v63 = vld [vmem:[%s1375_s0 + $0x28] sm:$0xff]  ;;  %v21_v0 = vld [vmem:[%s1375_s0 + $0x30] sm:$0xff]  ;;  %v22_v1 = vld [vmem:[%s1375_s0 + $0x38] sm:$0xff]  ;;  %s1201_s0 = smov [#allocation2]  }
   0x8   :  { %1077 = vmatprep.subr.bf16.mxu1 %v1196_v16  ;;  %1089 = vmatprep.subr.bf16.mxu0 %v1196_v16  ;;  %s900_s12 = sshll.u32 %s1201_s0, 4  ;;  %s901_s12 = int_to_ptr.vmem [resolvable:$true] %s900_s12 }
   0x9   :  { %988 = vmatprep.mubr.msk.f32.mxu0 %vm24_vm0, %v17_v40  ;;  %s1171_s13 = scalar_lea.vmem %s901_s12, 128  ;;  %p1176_p1 = scmp.lt.s32.totalorder %s901_s12, %s901_s12 }
   0xa   :  { %989 = vmatmul.mubr.msk.f32.gmra.mrb[2].mxu0 %vm24_vm0, %v18_v41  ;;  %p1172_p0 = scmp.ne.s32.totalorder %s901_s12, %s1171_s13  ;;  %p1177_p2 = scmp.lt.s32.totalorder %s1171_s13, %s1171_s13 }
   0xb   :  { %1079 = vmatpush3.bf16.msra.mxu1 %v1253_v20  ;;  %1091 = vmatpush3.bf16.msra.mxu0 %v1253_v20 }
   0xc   :  { %1080 = vmatprep.subr.bf16.mxu1 %v1196_v16  ;;  %1098 = vmatprep.subr.bf16.mxu0 %v1196_v16  ;;  %p1178_p3 = por %p1177_p2, %p1176_p1 }
   0xd   :  { %991 = vmatprep.mubr.msk.f32.mxu0 %vm24_vm0, %v19_v62 }
   0xe   :  { %992 = vmatmul.mubr.msk.f32.gmra.mrb[4].mxu0 %vm24_vm0, %v20_v63  ;;  %p1179_p4 = pnand %p1178_p3, %p1172_p0 }
   0xf   :  { %994 = vmatprep.mubr.msk.f32.mxu0 %vm24_vm0, %v21_v0 }
  0x12   :  { %995 = vmatmul.mubr.msk.f32.gmra.mrb[6].mxu0 %vm24_vm0, %v22_v1 }
  0x13   :  { %1027 = vmatprep.mubr.msk.f32.mxu0 %vm1197_vm1, %v1198_v19 }
  0xd8   :  { %v987_v3 = vpop.f32.mrb[0].mxu0 }
  0xd9   :  { %v115_v4 = vpop.f32.mrb[1].mxu0 }
  0xda   :  { %v916_v5 = vmul.f32 -1.442695, %v115_v4 }
  0xdc   :  { %1123 = vpow2.f32 %v916_v5 }
  0xdd   :  { %v990_v45 = vpop.f32.mrb[2].mxu0 }
  0xde   :  { %v125_v46 = vpop.f32.mrb[3].mxu0 }
  0xe1   :  { %v1312_v5 = vpop.f32.mrb[4].mxu0 }
  0xe6   :  { %v1124_v6 = vpop.eup %1123 }
  0xe7   :  { %v161_v7 = vadd.f32 1.0, %v1124_v6  ;;  %v135_v6 = vpop.f32.mrb[5].mxu0 }
  0xe9   :  { %1125 = vrcp.f32 %v161_v7  ;;  %v1314_v7 = vpop.f32.mrb[6].mxu0 }
  0xf3   :  { %v1126_v8 = vpop.eup %1125 }
  0xf4   :  { %v164_v9 = vmul.f32 2.0, %v1126_v8 }
  0xf6   :  { %v917_v10 = vadd.f32 -1.0, %v164_v9 }
  0xf8   :  { %167 = vrot.lane.b32.xlu0 %v917_v10, %s1195_s1 }
 0x16a   :  { %v168_v11 = vpop.permute.xlu0 %167 }
 0x16b   :  { %v170_v12 = vmul.f32 %v1126_v8, %v168_v11 }
 0x16d   :  { %1127 = vtanh.f32 %v170_v12 }
 0x177   :  { %v1128_v21 = vpop.eup %1127 }
 0x178   :  { %173 = vrot.lane.b32.xlu0 %v1128_v21, %s1199_s2 }
 0x17c   :  { %263 = vrot.lane.b32.xlu0 %v170_v12, %s1200_s26 }
 0x1ea   :  { %v174_v22 = vpop.permute.xlu0 %173 }
 0x1eb   :  { %v176_v23 = vmul.f32 %v1126_v8, %v174_v22  ;;  %v1316_v8 = vpop.f32.mrb[7].mxu0 }
 0x1ed   :  { %178 = vrot.lane.b32.xlu1 %v176_v23, %s1200_s26 }
 0x1ee   :  { %v264_v36 = vpop.permute.xlu0 %263 }
 0x25f   :  { %v179_v24 = vpop.permute.xlu1 %178 }
 0x260   :  { %1006 = vmatmul.mubr.msk.f32.vlgmr.msra.gmra.mrb[0].mxu1 %vm180_vm2, %v179_v24 }
 0x261   :  { %1082 = vmatpush3.bf16.msra.mxu1 %v1244_v17  ;;  %1016 = vmatprep.mubr.msk.f32.mxu1 %vm1197_vm1, %v1198_v19 }
 0x262   :  { %1083 = vmatprep.subr.bf16.mxu1 %v1196_v16 }
 0x265   :  { %1085 = vmatpush3.bf16.msra.mxu1 %v1253_v20 }
 0x266   :  { %1092 = vmatprep.subr.bf16.mxu1 %v1196_v16 }
 0x333   :  { %v249_v25 = vpop.f32.mrb[0].mxu1 }
 0x334   :  { %v253_v26 = vadd.f32 %v987_v3, %v249_v25  ;;  %v1007_v27 = vpop.f32.mrb[1].mxu1 }
 0x336   :  { %v919_v28 = vmul.f32 -1.442695, %v253_v26 }
 0x338   :  { %1129 = vpow2.f32 %v919_v28 }
 0x342   :  { %v1130_v29 = vpop.eup %1129 }
 0x343   :  { %v257_v30 = vadd.f32 1.0, %v1130_v29 }
 0x345   :  { %1131 = vrcp.f32 %v257_v30 }
 0x34f   :  { %v1132_v31 = vpop.eup %1131 }
 0x350   :  { %v260_v32 = vmul.f32 2.0, %v1132_v31  ;;  %v266_v37 = vmul.f32 %v1132_v31, %v264_v36 }
 0x352   :  { %v920_v33 = vadd.f32 -1.0, %v260_v32 }
 0x354   :  { %268 = vrot.lane.b32.xlu1 %v920_v33, %s1195_s1 }
 0x3c6   :  { %v269_v34 = vpop.permute.xlu1 %268 }
 0x3c7   :  { %v271_v35 = vmul.f32 %v1132_v31, %v269_v34 }
 0x3c9   :  { %273 = vrot.lane.b32.xlu1 %v271_v35, %s1200_s26 }
 0x43b   :  { %v274_v38 = vpop.permute.xlu1 %273 }
 0x43c   :  { %v276_v39 = vadd.f32 %v274_v38, %v266_v37 }
 0x43e   :  { %1133 = vtanh.f32 %v276_v39 }
 0x448   :  { %v1134_v42 = vpop.eup %1133 }
 0x449   :  { %279 = vrot.lane.b32.xlu0 %v1134_v42, %s1195_s1 }
 0x4bb   :  { %v280_v43 = vpop.permute.xlu0 %279 }
 0x4bc   :  { %v282_v44 = vmul.f32 %v1132_v31, %v280_v43 }
 0x4be   :  { %284 = vrot.lane.b32.xlu1 %v282_v44, %s1200_s26 }
 0x530   :  { %v285_v47 = vpop.permute.xlu1 %284 }
 0x531   :  { %1017 = vmatmul.mubr.msk.f32.vlgmr.msra.gmra.mrb[2].mxu1 %vm180_vm2, %v285_v47 }
 0x532   :  { %1094 = vmatpush3.bf16.msra.mxu1 %v1244_v17  ;;  %1038 = vmatprep.mubr.msk.f32.mxu1 %vm1197_vm1, %v1198_v19 }
 0x533   :  { %1095 = vmatprep.subr.bf16.mxu1 %v1196_v16 }
 0x536   :  { %1097 = vmatpush3.bf16.msra.mxu1 %v1253_v20 }
 0x537   :  { %1104 = vmatprep.subr.bf16.mxu1 %v1196_v16 }
 0x604   :  { %v354_v48 = vpop.f32.mrb[2].mxu1 }
 0x605   :  { %v358_v49 = vadd.f32 %v354_v48, %v125_v46  ;;  %v1018_v50 = vpop.f32.mrb[3].mxu1 }
 0x607   :  { %v922_v51 = vmul.f32 -1.442695, %v358_v49 }
 0x609   :  { %1135 = vpow2.f32 %v922_v51 }
 0x613   :  { %v1136_v52 = vpop.eup %1135 }
 0x614   :  { %v362_v53 = vadd.f32 1.0, %v1136_v52 }
 0x616   :  { %1137 = vrcp.f32 %v362_v53 }
 0x620   :  { %v1138_v54 = vpop.eup %1137 }
 0x621   :  { %v365_v55 = vmul.f32 2.0, %v1138_v54  ;;  %v367_v59 = vmul.f32 %v1138_v54, %v276_v39 }
 0x623   :  { %v923_v56 = vadd.f32 -1.0, %v365_v55 }
 0x625   :  { %369 = vrot.lane.b32.xlu0 %v923_v56, %s1195_s1 }
 0x697   :  { %v370_v57 = vpop.permute.xlu0 %369 }
 0x698   :  { %v372_v58 = vmul.f32 %v1138_v54, %v370_v57 }
 0x69a   :  { %374 = vrot.lane.b32.xlu1 %v372_v58, %s1200_s26 }
 0x70c   :  { %v375_v60 = vpop.permute.xlu1 %374 }
 0x70d   :  { %v377_v61 = vadd.f32 %v375_v60, %v367_v59 }
 0x70f   :  { %1139 = vtanh.f32 %v377_v61 }
 0x719   :  { %v1140_v2 = vpop.eup %1139 }
 0x71a   :  { %380 = vrot.lane.b32.xlu0 %v1140_v2, %s1195_s1 }
 0x78c   :  { %v381_v3 = vpop.permute.xlu0 %380 }
 0x78d   :  { %v383_v4 = vmul.f32 %v1138_v54, %v381_v3 }
 0x78f   :  { %385 = vrot.lane.b32.xlu1 %v383_v4, %s1200_s26 }
 0x801   :  { %v386_v9 = vpop.permute.xlu1 %385 }
 0x802   :  { %1028 = vmatmul.mubr.msk.f32.vlgmr.msra.gmra.mrb[8].mxu0 %vm180_vm2, %v386_v9 }
 0x803   :  { %1100 = vmatpush3.bf16.msra.mxu0 %v1244_v17  ;;  %1049 = vmatprep.mubr.msk.f32.mxu0 %vm1197_vm1, %v1198_v19 }
 0x804   :  { %1101 = vmatprep.subr.bf16.mxu0 %v1196_v16 }
 0x807   :  { %1103 = vmatpush3.bf16.msra.mxu0 %v1253_v20 }
 0x808   :  { %1110 = vmatprep.subr.bf16.mxu0 %v1196_v16 }
 0x8d5   :  { %v455_v10 = vpop.f32.mrb[8].mxu0 }
 0x8d6   :  { %v459_v11 = vadd.f32 %v990_v45, %v455_v10  ;;  %v1029_v12 = vpop.f32.mrb[9].mxu0 }
 0x8d8   :  { %v925_v13 = vmul.f32 -1.442695, %v459_v11 }
 0x8da   :  { %1141 = vpow2.f32 %v925_v13 }
 0x8e4   :  { %v1142_v14 = vpop.eup %1141 }
 0x8e5   :  { %v463_v15 = vadd.f32 1.0, %v1142_v14 }
 0x8e7   :  { %1143 = vrcp.f32 %v463_v15 }
 0x8f1   :  { %v1144_v18 = vpop.eup %1143 }
 0x8f2   :  { %v466_v21 = vmul.f32 2.0, %v1144_v18  ;;  %v468_v25 = vmul.f32 %v1144_v18, %v377_v61 }
 0x8f4   :  { %v926_v22 = vadd.f32 -1.0, %v466_v21 }
 0x8f6   :  { %470 = vrot.lane.b32.xlu0 %v926_v22, %s1195_s1 }
 0x968   :  { %v471_v23 = vpop.permute.xlu0 %470 }
 0x969   :  { %v473_v24 = vmul.f32 %v1144_v18, %v471_v23 }
 0x96b   :  { %475 = vrot.lane.b32.xlu1 %v473_v24, %s1200_s26 }
 0x9dd   :  { %v476_v26 = vpop.permute.xlu1 %475 }
 0x9de   :  { %v478_v27 = vadd.f32 %v476_v26, %v468_v25 }
 0x9e0   :  { %1145 = vtanh.f32 %v478_v27 }
 0x9ea   :  { %v1146_v28 = vpop.eup %1145 }
 0x9eb   :  { %481 = vrot.lane.b32.xlu0 %v1146_v28, %s1195_s1 }
 0xa5d   :  { %v482_v29 = vpop.permute.xlu0 %481 }
 0xa5e   :  { %v484_v30 = vmul.f32 %v1144_v18, %v482_v29 }
 0xa60   :  { %486 = vrot.lane.b32.xlu1 %v484_v30, %s1200_s26 }
 0xad2   :  { %v487_v31 = vpop.permute.xlu1 %486 }
 0xad3   :  { %1039 = vmatmul.mubr.msk.f32.vlgmr.msra.gmra.mrb[4].mxu1 %vm180_vm2, %v487_v31 }
 0xad4   :  { %1106 = vmatpush3.bf16.msra.mxu1 %v1244_v17  ;;  %1060 = vmatprep.mubr.msk.f32.mxu1 %vm1197_vm1, %v1198_v19 }
 0xad5   :  { %1107 = vmatprep.subr.bf16.mxu1 %v1196_v16 }
 0xad8   :  { %1109 = vmatpush3.bf16.msra.mxu1 %v1253_v20 }
 0xba6   :  { %v556_v32 = vpop.f32.mrb[4].mxu1 }
 0xba7   :  { %v560_v33 = vadd.f32 %v556_v32, %v135_v6  ;;  %v1040_v34 = vpop.f32.mrb[5].mxu1 }
 0xba9   :  { %v928_v35 = vmul.f32 -1.442695, %v560_v33 }
 0xbab   :  { %1147 = vpow2.f32 %v928_v35 }
 0xbb5   :  { %v1148_v36 = vpop.eup %1147 }
 0xbb6   :  { %v564_v37 = vadd.f32 1.0, %v1148_v36 }
 0xbb8   :  { %1149 = vrcp.f32 %v564_v37 }
 0xbc2   :  { %v1150_v38 = vpop.eup %1149 }
 0xbc3   :  { %v567_v39 = vmul.f32 2.0, %v1150_v38  ;;  %v569_v43 = vmul.f32 %v1150_v38, %v478_v27 }
 0xbc5   :  { %v929_v40 = vadd.f32 -1.0, %v567_v39 }
 0xbc7   :  { %571 = vrot.lane.b32.xlu0 %v929_v40, %s1195_s1 }
 0xc39   :  { %v572_v41 = vpop.permute.xlu0 %571 }
 0xc3a   :  { %v574_v42 = vmul.f32 %v1150_v38, %v572_v41 }
 0xc3c   :  { %576 = vrot.lane.b32.xlu1 %v574_v42, %s1200_s26 }
 0xcae   :  { %v577_v44 = vpop.permute.xlu1 %576 }
 0xcaf   :  { %v579_v45 = vadd.f32 %v577_v44, %v569_v43 }
 0xcb1   :  { %1151 = vtanh.f32 %v579_v45 }
 0xcbb   :  { %v1152_v46 = vpop.eup %1151 }
 0xcbc   :  { %582 = vrot.lane.b32.xlu0 %v1152_v46, %s1195_s1 }
 0xd2e   :  { %v583_v47 = vpop.permute.xlu0 %582 }
 0xd2f   :  { %v585_v48 = vmul.f32 %v1150_v38, %v583_v47 }
 0xd31   :  { %587 = vrot.lane.b32.xlu1 %v585_v48, %s1200_s26 }
 0xda3   :  { %v588_v49 = vpop.permute.xlu1 %587 }
 0xda4   :  { %1050 = vmatmul.mubr.msk.f32.vlgmr.msra.gmra.mrb[10].mxu0 %vm180_vm2, %v588_v49 }
 0xda5   :  { %1112 = vmatpush3.bf16.msra.mxu0 %v1244_v17  ;;  %1071 = vmatprep.mubr.msk.f32.mxu0 %vm1197_vm1, %v1198_v19 }
 0xda6   :  { %1113 = vmatprep.subr.bf16.mxu0 %v1196_v16 }
 0xda9   :  { %1115 = vmatpush3.bf16.msra.mxu0 %v1253_v20 }
 0xe77   :  { %v657_v50 = vpop.f32.mrb[10].mxu0 }
 0xe78   :  { %v661_v51 = vadd.f32 %v1312_v5, %v657_v50  ;;  %v1051_v52 = vpop.f32.mrb[11].mxu0 }
 0xe7a   :  { %v931_v53 = vmul.f32 -1.442695, %v661_v51 }
 0xe7c   :  { %1153 = vpow2.f32 %v931_v53 }
 0xe86   :  { %v1154_v54 = vpop.eup %1153 }
 0xe87   :  { %v665_v55 = vadd.f32 1.0, %v1154_v54 }
 0xe89   :  { %1155 = vrcp.f32 %v665_v55 }
 0xe93   :  { %v1156_v56 = vpop.eup %1155 }
 0xe94   :  { %v668_v57 = vmul.f32 2.0, %v1156_v56  ;;  %v670_v16 = vmul.f32 %v1156_v56, %v579_v45 }
 0xe96   :  { %v932_v58 = vadd.f32 -1.0, %v668_v57 }
 0xe98   :  { %672 = vrot.lane.b32.xlu0 %v932_v58, %s1195_s1 }
 0xf0a   :  { %v673_v17 = vpop.permute.xlu0 %672 }
 0xf0b   :  { %v675_v19 = vmul.f32 %v1156_v56, %v673_v17 }
 0xf0d   :  { %677 = vrot.lane.b32.xlu1 %v675_v19, %s1200_s26 }
 0xf7f   :  { %v678_v20 = vpop.permute.xlu1 %677 }
 0xf80   :  { %v680_v59 = vadd.f32 %v678_v20, %v670_v16 }
 0xf82   :  { %1157 = vtanh.f32 %v680_v59 }
 0xf8c   :  { %v1158_v60 = vpop.eup %1157 }
 0xf8d   :  { %683 = vrot.lane.b32.xlu0 %v1158_v60, %s1195_s1 }
 0xfff   :  { %v684_v61 = vpop.permute.xlu0 %683 }
0x1000   :  { %v686_v62 = vmul.f32 %v1156_v56, %v684_v61 }
0x1002   :  { %688 = vrot.lane.b32.xlu1 %v686_v62, %s1200_s26 }
0x1074   :  { %v689_v63 = vpop.permute.xlu1 %688 }
0x1075   :  { %1061 = vmatmul.mubr.msk.f32.vlgmr.msra.gmra.mrb[6].mxu1 %vm180_vm2, %v689_v63 }
0x1148   :  { %v758_v0 = vpop.f32.mrb[6].mxu1 }
0x1149   :  { %v762_v1 = vadd.f32 %v758_v0, %v1316_v8  ;;  %v1062_v2 = vpop.f32.mrb[7].mxu1 }
0x114b   :  { %v934_v3 = vmul.f32 -1.442695, %v762_v1 }
0x114d   :  { %1159 = vpow2.f32 %v934_v3 }
0x1157   :  { %v1160_v4 = vpop.eup %1159 }
0x1158   :  { %v766_v5 = vadd.f32 1.0, %v1160_v4 }
0x115a   :  { %1161 = vrcp.f32 %v766_v5 }
0x1164   :  { %v1162_v6 = vpop.eup %1161 }
0x1165   :  { %v769_v9 = vmul.f32 2.0, %v1162_v6  ;;  %v771_v13 = vmul.f32 %v1162_v6, %v680_v59 }
0x1167   :  { %v935_v10 = vadd.f32 -1.0, %v769_v9 }
0x1169   :  { %773 = vrot.lane.b32.xlu0 %v935_v10, %s1195_s1 }
0x11db   :  { %v774_v11 = vpop.permute.xlu0 %773 }
0x11dc   :  { %v776_v12 = vmul.f32 %v1162_v6, %v774_v11 }
0x11de   :  { %778 = vrot.lane.b32.xlu1 %v776_v12, %s1200_s26 }
0x1250   :  { %v779_v14 = vpop.permute.xlu1 %778 }
0x1251   :  { %v781_v15 = vadd.f32 %v779_v14, %v771_v13 }
0x1253   :  { %1163 = vtanh.f32 %v781_v15 }
0x125d   :  { %v1164_v8 = vpop.eup %1163 }
0x125e   :  { %784 = vrot.lane.b32.xlu0 %v1164_v8, %s1195_s1 }
0x12d0   :  { %v785_v18 = vpop.permute.xlu0 %784 }
0x12d1   :  { %v787_v21 = vmul.f32 %v1162_v6, %v785_v18 }
0x12d3   :  { %789 = vrot.lane.b32.xlu1 %v787_v21, %s1200_s26 }
0x1345   :  { %v790_v22 = vpop.permute.xlu1 %789 }
0x1346   :  { %1072 = vmatmul.mubr.msk.f32.vlgmr.msra.gmra.mrb[12].mxu0 %vm180_vm2, %v790_v22 }
0x1419   :  { %v859_v23 = vpop.f32.mrb[12].mxu0 }
0x141a   :  { %v863_v24 = vadd.f32 %v1314_v7, %v859_v23  ;;  %v1073_v25 = vpop.f32.mrb[13].mxu0 }
0x141c   :  { %v937_v26 = vmul.f32 -1.442695, %v863_v24 }
0x141e   :  { %1165 = vpow2.f32 %v937_v26 }
0x1428   :  { %v1166_v27 = vpop.eup %1165 }
0x1429   :  { %v867_v28 = vadd.f32 1.0, %v1166_v27 }
0x142b   :  { %1167 = vrcp.f32 %v867_v28 }
0x1435   :  { %v1168_v29 = vpop.eup %1167 }
0x1436   :  { %v870_v30 = vmul.f32 2.0, %v1168_v29  ;;  %v872_v34 = vmul.f32 %v1168_v29, %v781_v15 }
0x1438   :  { %v938_v31 = vadd.f32 -1.0, %v870_v30 }
0x143a   :  { %874 = vrot.lane.b32.xlu0 %v938_v31, %s1195_s1 }
0x14ac   :  { %v875_v32 = vpop.permute.xlu0 %874 }
0x14ad   :  { %v877_v33 = vmul.f32 %v1168_v29, %v875_v32 }
0x14af   :  { %879 = vrot.lane.b32.xlu1 %v877_v33, %s1200_s26 }
0x1521   :  { %v880_v35 = vpop.permute.xlu1 %879 }
0x1522   :  { %v882_v36 = vadd.f32 %v880_v35, %v872_v34 }
0x1524   :  { %1169 = vtanh.f32 %v882_v36 }
0x152e   :  { %v1170_v7 = vpop.eup %1169 }
0x152f   :  { %885 = vrot.lane.b32.xlu0 %v1170_v7, %s1195_s1 }
0x15a1   :  { %v886_v37 = vpop.permute.xlu0 %885 }
0x15a2   :  { %v888_v38 = vmul.f32 %v1168_v29, %v886_v37 }
0x15a4   :  { %890 = vrot.lane.b32.xlu1 %v888_v38, %s1200_s26 }
0x1616   :  { %v891_v39 = vpop.permute.xlu1 %890 }
0x1617   :  { %893 = vst.msk [vmem:[#allocation2] sm:$0xff] %vm180_vm2, %v891_v39 }
0x1618   :  { %1182 = shalt.err (!%p1179_p4)
}
0x1619   :  { %s1183_s16 = scalar_lea.hbm %s1378_s3, 128 }
0x161a   :  { %p1184_p5 = scmp.ne.s32.totalorder %s1378_s3, %s1183_s16  ;;  %p1187_p6 = scmp.lt.u32.totalorder %s1183_s16, %s1378_s3 }
0x161c   :  { %p1189_p7 = pnand %p1187_p6, %p1184_p5 }
0x161e   :  { %1192 = shalt.err (!%p1189_p7)
}
0x161f   :  { %903 = dma.vmem_to_hbm [thread:$0]  %s901_s12, 128, %s1378_s3, [#allocation3]  }
0x1620   :  { %1193 = dma.done.wait [#allocation3], 128  }
0x1621   :  { %1194 = vsyncadd [#allocation3], 4294967168 }
0x1622   :  { %907 = vsyncpa [#allocation3], 1 }

</bundles_post_ra>
